<compile_context>
chip_gen: v7x
topology: tpu7x:2x2x1
jax: 0.10.0
libtpu: 0.0.40
codegen_flags: <defaults>
</compile_context>

<pallas_src>
import functools

import jax
import jax.numpy as jnp
from jax.experimental import pallas as pl
from jax.experimental.pallas import tpu as pltpu


# ------------------------------ small helpers ---------------------------------
def _largest_divisor_leq(n, cap):
    for d in range(min(n, cap), 0, -1):
        if n % d == 0:
            return d
    return n


def _round_up(n, m):
    return ((n + m - 1) // m) * m


def _device_kind():
    try:
        return jax.devices()[0].device_kind.lower()
    except Exception:
        return ""


def _vmem_limit_bytes():
    # v7x: 64 MiB physical -> leave headroom; v5e/v6e: 128 MiB physical and
    # only 16/32 MiB scoped by default -> raise it.
    if "v7" in _device_kind():
        return 48 * 1024 * 1024
    return 96 * 1024 * 1024


def _batch_block(B):
    # v5e/v6e have a single TensorCore: the grid is a serial loop, so use the
    # whole batch per block (MXU M = B). On v7x split the batch in two for
    # Megacore only when the halves stay sublane-aligned.
    if "v7" in _device_kind() and B % 2 == 0 and (B // 2) % 8 == 0:
        return B // 2
    return B


def _time_chunk(T):
    # Chunk of time steps per grid iteration (amortizes ~0.35us/step overhead).
    cap = 16 if "v7" in _device_kind() else 32
    return _largest_divisor_leq(T, cap)


def _resident_spec(block_shape, index_map):
    """BlockSpec for a grid-constant operand; single-buffer it to save VMEM."""
    try:
        return pl.BlockSpec(block_shape, index_map, pipeline_mode=pl.Buffered(1))
    except Exception:  # older jax without pipeline_mode / Buffered
        return pl.BlockSpec(block_shape, index_map)


# --------------------- hoisted (time-parallel) input projection ---------------
def _input_proj_kernel(x_ref, w_ref, b_ref, o_ref):
    # gates_x = x @ W_ih^T + (b_ih + b_hh); weight pre-transposed (D, 4Hp)
    acc = (
        jnp.dot(x_ref[...], w_ref[...], preferred_element_type=jnp.float32)
        + b_ref[...]
    )
    o_ref[...] = acc.astype(o_ref.dtype)


def input_projection(x_flat, wih_t, bias, out_dtype):
    """x_flat: (N, D), wih_t: (D, 4Hp), bias: (1, 4Hp) -> gates_x (N, 4Hp)."""
    N, D = x_flat.shape
    C = wih_t.shape[1]
    rb = N if N <= 512 else 512                 # fixed, 8-aligned row block
    cb = C if C <= 4096 else 2048               # tile 4H only when large
    n_r = pl.cdiv(N, rb)
    n_c = pl.cdiv(C, cb)
    w_imap = lambda i, j: (0, j)
    b_imap = lambda i, j: (0, j)
    if n_c == 1:
        w_spec = _resident_spec((D, cb), w_imap)
        b_spec = _resident_spec((1, cb), b_imap)
    else:
        w_spec = pl.BlockSpec((D, cb), w_imap)
        b_spec = pl.BlockSpec((1, cb), b_imap)
    return pl.pallas_call(
        _input_proj_kernel,
        out_shape=jax.ShapeDtypeStruct((N, C), out_dtype),
        grid_spec=pltpu.PrefetchScalarGridSpec(
            num_scalar_prefetch=0,
            grid=(n_r, n_c),
            in_specs=[
                pl.BlockSpec((rb, D), lambda i, j: (i, 0)),
                w_spec,
                b_spec,
            ],
            out_specs=pl.BlockSpec((rb, cb), lambda i, j: (i, j)),
        ),
        compiler_params=pltpu.CompilerParams(
            dimension_semantics=("parallel", "parallel"),
            vmem_limit_bytes=_vmem_limit_bytes(),
        ),
    )(x_flat, wih_t, bias)


# ------------------------------ recurrent kernels -----------------------------
def _lstm_cell_step(gx_t, h_prev, c_prev, whh_t, hp):
    """One LSTM time step; gates_x precomputed, gate slices lane-aligned (Hp)."""
    gates = gx_t.astype(jnp.float32) + jnp.dot(
        h_prev.astype(whh_t.dtype), whh_t, preferred_element_type=jnp.float32)
    # PyTorch gate ordering: input, forget, cell(g), output
    i = jax.nn.sigmoid(gates[:, 0 * hp:1 * hp])
    f = jax.nn.sigmoid(gates[:, 1 * hp:2 * hp])
    g = jnp.tanh(gates[:, 2 * hp:3 * hp])
    o = jax.nn.sigmoid(gates[:, 3 * hp:4 * hp])
    c_new = f * c_prev + i * g
    h_new = o * jnp.tanh(c_new)
    return h_new, c_new


def _lstm_recur_kernel(gx_ref, whh_ref, hseq_ref, h_scr, c_scr, *, tc, hp):
    """Chunk of `tc` time steps of one LSTM layer; emits the hidden sequence."""
    @pl.when(pl.program_id(1) == 0)           # new batch block -> reset state
    def _():
        h_scr[...] = jnp.zeros_like(h_scr)
        c_scr[...] = jnp.zeros_like(c_scr)

    whh_t = whh_ref[...]                       # resident (Hp, 4Hp)

    def step(s, carry):
        h_prev, c_prev = carry
        h_new, c_new = _lstm_cell_step(gx_ref[s], h_prev, c_prev, whh_t, hp)
        hseq_ref[s] = h_new.astype(hseq_ref.dtype)
        return h_new, c_new

    h_fin, c_fin = jax.lax.fori_loop(
        0, tc, step, (h_scr[...], c_scr[...]), unroll=min(tc, 8))
    h_scr[...] = h_fin
    c_scr[...] = c_fin


def _lstm_recur_out_kernel(gx_ref, whh_ref, wout_ref, bout_ref, out_ref,
                           h_scr, c_scr, hbuf, *, tc, hp):
    """Last LSTM layer; the Linear head is applied ONCE per chunk (hoisted)."""
    @pl.when(pl.program_id(1) == 0)
    def _():
        h_scr[...] = jnp.zeros_like(h_scr)
        c_scr[...] = jnp.zeros_like(c_scr)

    whh_t = whh_ref[...]                       # resident (Hp, 4Hp)

    def step(s, carry):
        h_prev, c_prev = carry
        h_new, c_new = _lstm_cell_step(gx_ref[s], h_prev, c_prev, whh_t, hp)
        hbuf[s] = h_new
        return h_new, c_new

    h_fin, c_fin = jax.lax.fori_loop(
        0, tc, step, (h_scr[...], c_scr[...]), unroll=min(tc, 8))
    h_scr[...] = h_fin
    c_scr[...] = c_fin

    # Hoisted Linear head: one large MXU-friendly matmul + one dense store.
    bb = hbuf.shape[1]
    p = out_ref.shape[-1]
    h_chunk = hbuf[...].reshape(tc * bb, hp).astype(wout_ref.dtype)
    logits = (
        jnp.dot(h_chunk, wout_ref[...], preferred_element_type=jnp.float32)
        + bout_ref[...]
    )
    out_ref[...] = logits.reshape(tc, bb, p).astype(out_ref.dtype)


def lstm_layer(x_tm, wih_t, whh_t, bias, *, time_chunk=None):
    """x_tm: (T, B, d_in) time-major -> padded hidden sequence (T, B, Hp)."""
    T, B, d_in = x_tm.shape
    H4p = wih_t.shape[1]
    Hp = H4p // 4
    mm_dtype = whh_t.dtype

    gx = input_projection(
        x_tm.reshape(T * B, d_in).astype(mm_dtype), wih_t, bias, mm_dtype
    ).reshape(T, B, H4p)

    tc = time_chunk or _time_chunk(T)
    bb = _batch_block(B)
    kernel = functools.partial(_lstm_recur_kernel, tc=tc, hp=Hp)
    return pl.pallas_call(
        kernel,
        out_shape=jax.ShapeDtypeStruct((T, B, Hp), mm_dtype),
        grid_spec=pltpu.PrefetchScalarGridSpec(
            num_scalar_prefetch=0,
            grid=(B // bb, T // tc),                       # (batch, time-chunks)
            in_specs=[
                pl.BlockSpec((tc, bb, H4p), lambda b, t: (t, b, 0)),   # gates_x
                _resident_spec((Hp, H4p), lambda b, t: (0, 0)),        # W_hh^T
            ],
            out_specs=pl.BlockSpec((tc, bb, Hp), lambda b, t: (t, b, 0)),
            scratch_shapes=[
                pltpu.VMEM((bb, Hp), jnp.float32),   # h state
                pltpu.VMEM((bb, Hp), jnp.float32),   # c state
            ],
        ),
        compiler_params=pltpu.CompilerParams(
            dimension_semantics=("parallel", "arbitrary"),
            vmem_limit_bytes=_vmem_limit_bytes(),
        ),
    )(gx, whh_t)


def lstm_layer_with_output(x_tm, wih_t, whh_t, bias, wout_t, bout,
                           *, time_chunk=None):
    """Last LSTM layer fused with the Linear head -> logits (T, B, P)."""
    T, B, d_in = x_tm.shape
    H4p = wih_t.shape[1]
    Hp = H4p // 4
    P = wout_t.shape[1]
    mm_dtype = whh_t.dtype

    gx = input_projection(
        x_tm.reshape(T * B, d_in).astype(mm_dtype), wih_t, bias, mm_dtype
    ).reshape(T, B, H4p)

    tc = time_chunk or _time_chunk(T)
    bb = _batch_block(B)
    kernel = functools.partial(_lstm_recur_out_kernel, tc=tc, hp=Hp)
    return pl.pallas_call(
        kernel,
        out_shape=jax.ShapeDtypeStruct((T, B, P), jnp.float32),
        grid_spec=pltpu.PrefetchScalarGridSpec(
            num_scalar_prefetch=0,
            grid=(B // bb, T // tc),
            in_specs=[
                pl.BlockSpec((tc, bb, H4p), lambda b, t: (t, b, 0)),   # gates_x
                _resident_spec((Hp, H4p), lambda b, t: (0, 0)),        # W_hh^T
                _resident_spec((Hp, P), lambda b, t: (0, 0)),          # W_out^T
                _resident_spec((1, P), lambda b, t: (0, 0)),           # b_out
            ],
            out_specs=pl.BlockSpec((tc, bb, P), lambda b, t: (t, b, 0)),
            scratch_shapes=[
                pltpu.VMEM((bb, Hp), jnp.float32),        # h state
                pltpu.VMEM((bb, Hp), jnp.float32),        # c state
                pltpu.VMEM((tc, bb, Hp), jnp.float32),    # chunk hidden buffer
            ],
        ),
        compiler_params=pltpu.CompilerParams(
            dimension_semantics=("parallel", "arbitrary"),
            vmem_limit_bytes=_vmem_limit_bytes(),
        ),
    )(gx, whh_t, wout_t, bout)


# -------------------------------- parameters ----------------------------------
def init_baseline_params(key, mfccs, output_phonemes, units_per_layer,
                         num_layers):
    """Canonical PyTorch-layout LSTM/Linear parameters."""
    H = units_per_layer
    k = 1.0 / (H ** 0.5)
    lstm = []
    for layer in range(num_layers):
        d_in = mfccs if layer == 0 else H
        key, k1, k2, k3, k4 = jax.random.split(key, 5)
        w_ih = jax.random.uniform(k1, (4 * H, d_in), jnp.float32, -k, k)
        w_hh = jax.random.uniform(k2, (4 * H, H), jnp.float32, -k, k)
        b_ih = jax.random.uniform(k3, (4 * H,), jnp.float32, -k, k)
        b_hh = jax.random.uniform(k4, (4 * H,), jnp.float32, -k, k)
        lstm.append((w_ih, w_hh, b_ih, b_hh))
    key, k1, k2 = jax.random.split(key, 3)
    out_w = jax.random.uniform(k1, (output_phonemes, H), jnp.float32, -k, k)
    out_b = jax.random.uniform(k2, (output_phonemes,), jnp.float32, -k, k)
    return {"lstm": lstm, "out_w": out_w, "out_b": out_b}


def _pad_gate_cols(w_t, H, Hp):
    """(K, 4H) -> (K, 4*Hp): zero-pad each of the 4 gate column blocks."""
    if Hp == H:
        return w_t
    K = w_t.shape[0]
    w = w_t.reshape(K, 4, H)
    w = jnp.pad(w, ((0, 0), (0, 0), (0, Hp - H)))
    return w.reshape(K, 4 * Hp)


def _pad_rows(a, n):
    if a.shape[0] == n:
        return a
    return jnp.pad(a, ((0, n - a.shape[0]),) + ((0, 0),) * (a.ndim - 1))


def prepare_kernel_params(params, matmul_dtype=jnp.float32):
    """Pre-transposed, gate-padded (H -> Hp multiple of 128) kernel weights.

    Padded gate columns/rows are zero, so the padded hidden lanes stay exactly
    zero through the recurrence and the output head ignores them — results are
    bit-equivalent to the unpadded math (up to matmul dtype).
    """
    H = params["lstm"][0][1].shape[1]          # w_hh: (4H, H)
    Hp = _round_up(H, 128)
    layers = []
    for li, (w_ih, w_hh, b_ih, b_hh) in enumerate(params["lstm"]):
        wih_t = _pad_gate_cols(w_ih.T, H, Hp)                    # (d_in, 4Hp)
        if li > 0:
            wih_t = _pad_rows(wih_t, Hp)                         # hidden in is padded
        whh_t = _pad_rows(_pad_gate_cols(w_hh.T, H, Hp), Hp)     # (Hp, 4Hp)
        bias = _pad_gate_cols((b_ih + b_hh)[None, :], H, Hp)     # (1, 4Hp)
        layers.append((wih_t.astype(matmul_dtype),
                       whh_t.astype(matmul_dtype),
                       bias.astype(jnp.float32)))
    wout_t = _pad_rows(params["out_w"].T, Hp).astype(matmul_dtype)  # (Hp, P)
    bout = params["out_b"][None, :].astype(jnp.float32)             # (1, P)
    return {"lstm": layers, "out_w_t": wout_t, "out_b": bout,
            "H": H, "Hp": Hp}


# -------------------------------- Baseline model ------------------------------
def baseline_forward(kparams, x):
    """x: (batch, seq, mfccs) -> logits with torch.squeeze(out, dim=1) semantics."""
    # TODO(synk): emit batch-major gx/logits directly from the kernels to drop
    # these two (small) host transposes entirely.
    h = jnp.transpose(x, (1, 0, 2)).astype(jnp.float32)   # time-major (T, B, D)
    for (wih_t, whh_t, bias) in kparams["lstm"][:-1]:
        h = lstm_layer(h, wih_t, whh_t, bias)              # (T, B, Hp)
        # TODO(synk): inter-layer dropout is train-only; not applied at inference.
        # TODO(synk): optionally fuse the next layer's input projection into this
        # kernel to avoid the HBM round-trip of the hidden sequence.
    wih_t, whh_t, bias = kparams["lstm"][-1]
    logits = lstm_layer_with_output(h, wih_t, whh_t, bias,
                                    kparams["out_w_t"], kparams["out_b"])
    logits = jnp.transpose(logits, (1, 0, 2))               # back to (B, T, P)
    # torch.squeeze(out, dim=1): only drops dim 1 when it has size 1
    if logits.shape[1] == 1:
        logits = jnp.squeeze(logits, axis=1)
    return logits


# ------------------------------ pure-JAX reference ----------------------------
def reference_forward(params, x):
    B = x.shape[0]
    h_seq = jnp.transpose(x, (1, 0, 2)).astype(jnp.float32)
    for (w_ih, w_hh, b_ih, b_hh) in params["lstm"]:
        H = w_hh.shape[1]
        wih_t, whh_t = w_ih.T, w_hh.T
        bias = b_ih + b_hh

        def cell(carry, x_t, wih_t=wih_t, whh_t=whh_t, bias=bias, H=H):
            h, c = carry
            gates = (
                jnp.dot(x_t, wih_t, precision=jax.lax.Precision.HIGHEST)
                + jnp.dot(h, whh_t, precision=jax.lax.Precision.HIGHEST)
                + bias
            )
            i = jax.nn.sigmoid(gates[:, 0 * H:1 * H])
            f = jax.nn.sigmoid(gates[:, 1 * H:2 * H])
            g = jnp.tanh(gates[:, 2 * H:3 * H])
            o = jax.nn.sigmoid(gates[:, 3 * H:4 * H])
            c = f * c + i * g
            h = o * jnp.tanh(c)
            return (h, c), h

        init = (jnp.zeros((B, H), jnp.float32), jnp.zeros((B, H), jnp.float32))
        _, h_seq = jax.lax.scan(cell, init, h_seq)
    logits = (
        jnp.einsum("tbh,ph->tbp", h_seq, params["out_w"],
                   precision=jax.lax.Precision.HIGHEST)
        + params["out_b"]
    )
    logits = jnp.transpose(logits, (1, 0, 2))
    if logits.shape[1] == 1:
        logits = jnp.squeeze(logits, axis=1)
    return logits


if __name__ == "__main__":
    # Small, deterministic config: mfccs=32, units_per_layer=32, num_layers=2,
    # output_phonemes=16; batch=2, seq=8.
    mfccs = 32
    output_phonemes = 16
    units_per_layer = 32
    num_layers = 2
    batch, seq = 2, 8

    key = jax.random.PRNGKey(0)
    key, pkey, xkey = jax.random.split(key, 3)

    params = init_baseline_params(
        pkey, mfccs, output_phonemes, units_per_layer, num_layers)
    x = jax.random.normal(xkey, (batch, seq, mfccs), jnp.float32)

    ref = reference_forward(params, x)

    # f32 MXU operands (strict check)
    kp32 = prepare_kernel_params(params, jnp.float32)
    out = baseline_forward(kp32, x)
    jax.block_until_ready(out)
    assert out.shape == (batch, seq, output_phonemes), out.shape
    assert bool(jnp.all(jnp.isfinite(out)))
    err32 = float(jnp.max(jnp.abs(out - ref)))
    assert jnp.allclose(out, ref, atol=5e-3, rtol=5e-3), err32

    # bf16 MXU operands, f32 accumulation (recommended on v6e/v7x) — looser
    # tolerance since bf16 error compounds over the sequence.
    kp16 = prepare_kernel_params(params, jnp.bfloat16)
    out16 = baseline_forward(kp16, x)
    jax.block_until_ready(out16)
    assert bool(jnp.all(jnp.isfinite(out16)))
    err16 = float(jnp.max(jnp.abs(out16 - ref)))
    assert jnp.allclose(out16, ref, atol=5e-2, rtol=5e-2), err16

    print("KERNEL_OK")
</pallas_src>

<mosaic_0001>
module attributes {stable_mosaic.version = 11 : i64} {
  func.func @_input_proj_kernel(%arg0: i32, %arg1: i32, %arg2: memref<16x32xf32, #tpu.memory_space<vmem>>, %arg3: memref<32x512xf32, #tpu.memory_space<vmem>>, %arg4: memref<1x512xf32, #tpu.memory_space<vmem>>, %arg5: memref<16x512xf32, #tpu.memory_space<vmem>>) attributes {dimension_semantics = [#tpu.dimension_semantics<parallel>, #tpu.dimension_semantics<parallel>], iteration_bounds = array<i64: 1, 1>, scalar_prefetch = 0 : i64, scratch_operands = 0 : i64, tpu.core_type = #tpu.core_type<tc>, window_params = [{transform_indices = @transform_0, window_bounds = array<i64: 16, 32>}, {pipeline_mode = #tpu.pipeline_mode<synchronous>, transform_indices = @transform_1, window_bounds = array<i64: 32, 512>}, {pipeline_mode = #tpu.pipeline_mode<synchronous>, transform_indices = @transform_2, window_bounds = array<i64: 1, 512>}, {transform_indices = @transform_3, window_bounds = array<i64: 16, 512>}]} {
    %c0 = arith.constant 0 : index
    %c0_0 = arith.constant 0 : index
    %0 = vector.load %arg2[%c0, %c0_0] : memref<16x32xf32, #tpu.memory_space<vmem>>, vector<16x32xf32>
    %c0_1 = arith.constant 0 : index
    %c0_2 = arith.constant 0 : index
    %1 = vector.load %arg3[%c0_1, %c0_2] : memref<32x512xf32, #tpu.memory_space<vmem>>, vector<32x512xf32>
    %cst = arith.constant dense<0.000000e+00> : vector<16x512xf32>
    %2 = tpu.matmul %0, %1, %cst {dimension_numbers = #tpu.dot_dimension_numbers<[1], [0], [0], [1], [0, 0, 1, 1], [], []>} : vector<16x32xf32>, vector<32x512xf32>, vector<16x512xf32> -> vector<16x512xf32>
    %c0_3 = arith.constant 0 : index
    %c0_4 = arith.constant 0 : index
    %3 = vector.load %arg4[%c0_3, %c0_4] : memref<1x512xf32, #tpu.memory_space<vmem>>, vector<1x512xf32>
    %4 = vector.broadcast %3 : vector<1x512xf32> to vector<16x512xf32>
    %5 = arith.addf %2, %4 : vector<16x512xf32>
    %c0_5 = arith.constant 0 : index
    %c0_6 = arith.constant 0 : index
    %6 = vector.load %arg5[%c0_5, %c0_6] : memref<16x512xf32, #tpu.memory_space<vmem>>, vector<16x512xf32>
    tpu.vector_store %arg5[%c0_5, %c0_6], %5 {strides = array<i32>} : memref<16x512xf32, #tpu.memory_space<vmem>>, vector<16x512xf32>,
    return
  }
  func.func @transform_0(%arg0: i32, %arg1: i32) -> (i32, i32) {
    %c0_i32 = arith.constant 0 : i32
    %c0_i32_0 = arith.constant 0 : i32
    return %arg0, %c0_i32 : i32, i32
  }
  func.func @transform_1(%arg0: i32, %arg1: i32) -> (i32, i32) {
    %c0_i32 = arith.constant 0 : i32
    %c0_i32_0 = arith.constant 0 : i32
    return %c0_i32, %arg1 : i32, i32
  }
  func.func @transform_2(%arg0: i32, %arg1: i32) -> (i32, i32) {
    %c0_i32 = arith.constant 0 : i32
    %c0_i32_0 = arith.constant 0 : i32
    return %c0_i32, %arg1 : i32, i32
  }
  func.func @transform_3(%arg0: i32, %arg1: i32) -> (i32, i32) {
    %c0_i32 = arith.constant 0 : i32
    return %arg0, %arg1 : i32, i32
  }
}

</mosaic_0001>

<bundles_post_ra>
// kernel: tpu_custom_call.1
= control target key start
LH: loop header
LB: loop body
LE: loop exit
PB: predicated region body
PF: predicated region fallthrough
CT: control target
= control target key end

     0   :  { %8 = vsyncpa [#allocation3], 0  ;;  %s487_s0 = inlined_call_operand.hbm [shape: f32[16,32], index: 0, kind: input, shape index: {}]   ;;  %s488_s1 = inlined_call_operand.hbm [shape: f32[32,512], index: 1, kind: input, shape index: {}]   ;;  %s489_s2 = inlined_call_operand.hbm [shape: f32[1,512], index: 2, kind: input, shape index: {}]   ;;  %s490_s3 = inlined_call_operand.hbm [shape: f32[16,512], index: 3, kind: output, shape index: {}]  }
   0x1   :  { %9 = vsyncpa [#allocation6], 0 }
   0x2   :  { %10 = vsyncpa [#allocation4], 0  ;;  %s404_s12 = smov [#allocation5]   ;;  %s310_s16 = scalar_lea.hbm %s488_s1, 2048 }
   0x3   :  { %s28_s13 = sshll.u32 %s404_s12, 4  ;;  %p311_p0 = scmp.ne.s32.totalorder %s488_s1, %s310_s16  ;;  %s29_s13 = int_to_ptr.vmem [resolvable:$true] %s28_s13 }
   0x4   :  { %p314_p1 = scmp.lt.u32.totalorder %s310_s16, %s488_s1 }
   0x6   :  { %p316_p2 = pnand %p314_p1, %p311_p0 }
   0x8   :  { %319 = shalt.err (!%p316_p2)
}
   0x9   :  { %s320_s21 = scalar_lea.vmem %s29_s13, 2048  ;;  %p325_p4 = scmp.lt.s32.totalorder %s29_s13, %s29_s13 }
   0xa   :  { %p321_p3 = scmp.ne.s32.totalorder %s29_s13, %s320_s21  ;;  %p326_p5 = scmp.lt.s32.totalorder %s320_s21, %s320_s21 }
   0xc   :  { %p327_p6 = por %p326_p5, %p325_p4 }
   0xe   :  { %p328_p7 = pnand %p327_p6, %p321_p3 }
  0x10   :  { %331 = shalt.err (!%p328_p7)
}
  0x11   :  { %s405_s22 = smov 512   ;;  %s406_s23 = smov 32  }
  0x12   :  { %34 = dma.hbm_to_vmem [thread:$0]  %s488_s1, 2048, %s29_s13, [#allocation6], %s405_s22, %s405_s22, %s406_s23  }
  0x13   :  { %s407_s26 = smov [#allocation2]   ;;  %s332_s30 = scalar_lea.hbm %s487_s0, 256 }
  0x14   :  { %s16_s27 = sshll.u32 %s407_s26, 4  ;;  %p333_p8 = scmp.ne.s32.totalorder %s487_s0, %s332_s30  ;;  %s17_s27 = int_to_ptr.vmem [resolvable:$true] %s16_s27 }
  0x15   :  { %p336_p9 = scmp.lt.u32.totalorder %s332_s30, %s487_s0 }
  0x17   :  { %p338_p10 = pnand %p336_p9, %p333_p8 }
  0x19   :  { %341 = shalt.err (!%p338_p10)
}
  0x1a   :  { %s342_s8 = scalar_lea.vmem %s17_s27, 256  ;;  %p347_p12 = scmp.lt.s32.totalorder %s17_s27, %s17_s27 }
  0x1b   :  { %p343_p11 = scmp.ne.s32.totalorder %s17_s27, %s342_s8  ;;  %p348_p13 = scmp.lt.s32.totalorder %s342_s8, %s342_s8 }
  0x1d   :  { %p349_p0 = por %p348_p13, %p347_p12 }
  0x1f   :  { %p350_p1 = pnand %p349_p0, %p343_p11 }
  0x21   :  { %353 = shalt.err (!%p350_p1)
}
  0x22   :  { %s408_s1 = smov 128   ;;  %s409_s9 = smov 8  }
  0x23   :  { %22 = dma.hbm_to_vmem [thread:$0]  %s487_s0, 256, %s17_s27, [#allocation3], %s408_s1, %s408_s1, %s409_s9  }
  0x24   :  { %s410_s12 = smov [#allocation7]   ;;  %s354_s16 = scalar_lea.hbm %s489_s2, 64 }
  0x25   :  { %s41_s13 = sshll.u32 %s410_s12, 4  ;;  %p355_p2 = scmp.ne.s32.totalorder %s489_s2, %s354_s16  ;;  %s42_s13 = int_to_ptr.vmem [resolvable:$true] %s41_s13 }
  0x26   :  { %p358_p3 = scmp.lt.u32.totalorder %s354_s16, %s489_s2 }
  0x28   :  { %p360_p4 = pnand %p358_p3, %p355_p2 }
  0x2a   :  { %363 = shalt.err (!%p360_p4)
}
  0x2b   :  { %s364_s21 = scalar_lea.vmem %s42_s13, 64  ;;  %p369_p6 = scmp.lt.s32.totalorder %s42_s13, %s42_s13 }
  0x2c   :  { %p365_p5 = scmp.ne.s32.totalorder %s42_s13, %s364_s21  ;;  %p370_p7 = scmp.lt.s32.totalorder %s364_s21, %s364_s21 }
  0x2e   :  { %p371_p8 = por %p370_p7, %p369_p6 }
  0x30   :  { %p372_p9 = pnand %p371_p8, %p365_p5 }
  0x32   :  { %375 = shalt.err (!%p372_p9)
}
  0x33   :  { %44 = dma.hbm_to_vmem [thread:$0]  %s489_s2, 64, %s42_s13, [#allocation6]  }
  0x34   :  { %398 = dma.done.wait [#allocation3], 256  }
  0x35   :  { %399 = vsyncadd [#allocation3], 4294967040 }
  0x36   :  { %400 = dma.done.wait [#allocation6], 2112  }
  0x37   :  { %401 = vsyncadd [#allocation6], 4294965184  ;;  %v411_v0 = vmov 0.0   ;;  %v57_v1 = vld [vmem:[#allocation5 + $0x8] sm:$0xff]  ;;  %v59_v3 = vld [vmem:[#allocation5 + $0x18] sm:$0xff]  ;;  %vm94_vm0 = vcmask 261120   ;;  %v74_v27 = vlaneseq }
  0x38   :  { %165 = vmatprep.mubr.f32.mxu0 %v411_v0  ;;  %242 = vmatprep.mubr.f32.mxu1 %v411_v0  ;;  %v61_v2 = vld [vmem:[#allocation5 + $0x28] sm:$0xff]  ;;  %v63_v5 = vld [vmem:[#allocation5 + $0x38] sm:$0xff]  ;;  %v56_v6 = vld [vmem:[#allocation5] sm:$0xff]  ;;  %s412_s2 = smov [#allocation8]  }
  0x39   :  { %v285_v4 = vpack.c.bf16 %v61_v2, %v57_v1  ;;  %v60_v7 = vld [vmem:[#allocation5 + $0x20] sm:$0xff]  ;;  %v293_v8 = vpack.c.bf16 %v63_v5, %v59_v3  ;;  %v58_v10 = vld [vmem:[#allocation5 + $0x10] sm:$0xff]  ;;  %v65_v12 = vld [vmem:[#allocation5 + $0x48] sm:$0xff]  ;;  %v75_v28 = vshrl.u32 %v74_v27, 7  ;;  %s268_s25 = sshll.u32 %s412_s2, 4  ;;  %s269_s25 = int_to_ptr.vmem [resolvable:$true] %s268_s25 }
  0x3a   :  { %v287_v9 = vpack.c.bf16 %v60_v7, %v56_v6  ;;  %v62_v11 = vld [vmem:[#allocation5 + $0x30] sm:$0xff]  ;;  %v69_v14 = vld [vmem:[#allocation5 + $0x68] sm:$0xff]  ;;  %v67_v15 = vld [vmem:[#allocation5 + $0x58] sm:$0xff]  ;;  %s376_s26 = scalar_lea.vmem %s269_s25, 1024  ;;  %p381_p11 = scmp.lt.s32.totalorder %s269_s25, %s269_s25 }
  0x3b   :  { %286 = vmatprep.subr.bf16.mxu0 %v285_v4  ;;  %v295_v13 = vpack.c.bf16 %v62_v11, %v58_v10  ;;  %v71_v16 = vld [vmem:[#allocation5 + $0x78] sm:$0xff]  ;;  %294 = vmatprep.subr.bf16.mxu1 %v293_v8  ;;  %v289_v17 = vpack.c.bf16 %v69_v14, %v65_v12  ;;  %v64_v19 = vld [vmem:[#allocation5 + $0x40] sm:$0xff]  ;;  %v66_v21 = vld [vmem:[#allocation5 + $0x50] sm:$0xff]  ;;  %v76_v29 = vsub.s32 0, %v75_v28  ;;  %v84_v31 = vsub.s32 2, %v75_v28  ;;  %p377_p10 = scmp.ne.s32.totalorder %s269_s25, %s376_s26  ;;  %p382_p12 = scmp.lt.s32.totalorder %s376_s26, %s376_s26 }
  0x3c   :  { %288 = vmatpush1.bf16.msra.mxu0 %v287_v9  ;;  %v297_v18 = vpack.c.bf16 %v71_v16, %v67_v15  ;;  %v68_v20 = vld [vmem:[#allocation5 + $0x60] sm:$0xff]  ;;  %v70_v23 = vld [vmem:[#allocation5 + $0x70] sm:$0xff]  ;;  %v55_v26 = vld [vmem:[#allocation2 + $0x8] sm:$0xff]  ;;  %v80_v32 = vsub.s32 1, %v75_v28  ;;  %v88_v33 = vsub.s32 3, %v75_v28 }
  0x3d   :  { %296 = vmatpush1.bf16.msra.mxu1 %v295_v13  ;;  %v291_v22 = vpack.c.bf16 %v68_v20, %v64_v19  ;;  %290 = vmatprep.subr.bf16.mxu0 %v289_v17  ;;  %v299_v24 = vpack.c.bf16 %v70_v23, %v66_v21  ;;  %v54_v25 = vld [vmem:[#allocation2] sm:$0xff]  ;;  %v72_v30 = vld [vmem:[#allocation7] sm:$0xf]  ;;  %p383_p13 = por %p382_p12, %p381_p11 }
  0x3e   :  { %298 = vmatprep.subr.bf16.mxu1 %v297_v18  ;;  %v77_v34 = vrot.slane %v72_v30, %v76_v29  ;;  %v85_v35 = vrot.slane %v72_v30, %v84_v31  ;;  %v81_v36 = vrot.slane %v72_v30, %v80_v32  ;;  %v89_v37 = vrot.slane %v72_v30, %v88_v33 }
  0x3f   :  { %p384_p0 = pnand %p383_p13, %p377_p10 }
  0x40   :  { %292 = vmatpush1.bf16.msra.mxu0 %v291_v22 }
  0x41   :  { %300 = vmatpush1.bf16.msra.mxu1 %v299_v24 }
  0x43   :  { %281 = vmatmul.mubr.msk.f32.vlgmr.msra.gmra.mrb[0].mxu0 %vm94_vm0, %v54_v25 }
  0x44   :  { %283 = vmatmul.mubr.msk.f32.vlgmr.msra.gmra.mrb[0].mxu1 %vm94_vm0, %v54_v25  ;;  %171 = vmatprep.mubr.f32.mxu0 %v411_v0 }
  0x45   :  { %248 = vmatprep.mubr.f32.mxu1 %v411_v0 }
  0x47   :  { %282 = vmatmul.mubr.msk.f32.gmra.mrb[2].mxu0 %vm94_vm0, %v55_v26 }
  0x48   :  { %284 = vmatmul.mubr.msk.f32.gmra.mrb[2].mxu1 %vm94_vm0, %v55_v26 }
 0x116   :  { %v167_v38 = vpop.f32.mrb[0].mxu0 }
 0x117   :  { %v168_v39 = vadd.f32 %v167_v38, %v77_v34  ;;  %v244_v40 = vpop.f32.mrb[0].mxu1  ;;  %v169_v41 = vpop.f32.mrb[1].mxu0 }
 0x118   :  { %v245_v42 = vadd.f32 %v244_v40, %v85_v35  ;;  %v170_v43 = vadd.f32 %v169_v41, %v81_v36  ;;  %v246_v44 = vpop.f32.mrb[1].mxu1 }
 0x119   :  { %255 = vst [vmem:[#allocation8] sm:$0xff] %v168_v39  ;;  %v247_v45 = vadd.f32 %v246_v44, %v89_v37 }
 0x11a   :  { %257 = vst [vmem:[#allocation8 + $0x10] sm:$0xff] %v245_v42  ;;  %256 = vst [vmem:[#allocation8 + $0x8] sm:$0xff] %v170_v43  ;;  %v173_v46 = vpop.f32.mrb[2].mxu0 }
 0x11b   :  { %258 = vst [vmem:[#allocation8 + $0x18] sm:$0xff] %v247_v45  ;;  %v174_v47 = vadd.f32 %v173_v46, %v77_v34  ;;  %v250_v48 = vpop.f32.mrb[2].mxu1  ;;  %v175_v49 = vpop.f32.mrb[3].mxu0 }
 0x11c   :  { %v251_v50 = vadd.f32 %v250_v48, %v85_v35  ;;  %v176_v51 = vadd.f32 %v175_v49, %v81_v36  ;;  %v252_v52 = vpop.f32.mrb[3].mxu1 }
 0x11d   :  { %259 = vst [vmem:[#allocation8 + $0x20] sm:$0xff] %v174_v47  ;;  %v253_v53 = vadd.f32 %v252_v52, %v89_v37 }
 0x11e   :  { %261 = vst [vmem:[#allocation8 + $0x30] sm:$0xff] %v251_v50  ;;  %260 = vst [vmem:[#allocation8 + $0x28] sm:$0xff] %v176_v51 }
 0x11f   :  { %262 = vst [vmem:[#allocation8 + $0x38] sm:$0xff] %v253_v53 }
 0x120   :  { %387 = shalt.err (!%p384_p0)
}
 0x121   :  { %s388_s29 = scalar_lea.hbm %s490_s3, 1024 }
 0x122   :  { %p389_p1 = scmp.ne.s32.totalorder %s490_s3, %s388_s29  ;;  %p392_p2 = scmp.lt.u32.totalorder %s388_s29, %s490_s3 }
 0x124   :  { %p394_p3 = pnand %p392_p2, %p389_p1 }
 0x126   :  { %397 = shalt.err (!%p394_p3)
}
 0x127   :  { %274 = dma.vmem_to_hbm [thread:$0]  %s269_s25, 1024, %s490_s3, [#allocation4], %s405_s22, %s405_s22, %s406_s23  }
 0x128   :  { %402 = dma.done.wait [#allocation4], 1024  }
 0x129   :  { %403 = vsyncadd [#allocation4], 4294966272 }
 0x12a   :  { %278 = vsyncpa [#allocation3], 1 }
 0x12b   :  { %279 = vsyncpa [#allocation6], 1 }
 0x12c   :  { %280 = vsyncpa [#allocation4], 1 }

</bundles_post_ra>
